<compile_context>
chip_gen: v7x
topology: tpu7x:2x2x1
jax: 0.10.0
libtpu: 0.0.40
codegen_flags: <defaults>
</compile_context>

<pallas_src>
import math

import jax
import jax.numpy as jnp
from jax.experimental import pallas as pl
from jax.experimental.pallas import tpu as pltpu

_BF16_P_THRESHOLD = 512        # only use bf16 MXU operands once p is large
_DEFAULT_SCOPED_VMEM = 24 << 20  # stay clear of the ~32 MiB default scoped limit


def generator_kernel(x_ref, loc_ref, wt_ref, o_ref):
    # (x + loc) in f32 on the VPU, then one MXU matmul against the
    # pre-transposed weight.  wt_ref.dtype is f32 for small p (the astype is a
    # no-op) and bf16 for large p (native-rate MXU); accumulation is f32.
    shifted = x_ref[...] + loc_ref[...]                       # (tb, p) f32
    o_ref[...] = jnp.dot(
        shifted.astype(wt_ref.dtype), wt_ref[...],
        preferred_element_type=jnp.float32,
    ).astype(o_ref.dtype)


def prepare_generator_params(loc, weight):
    """One-time parameter prep (NOT in the per-forward path).

    Stores W^T as the canonical layout (hoists the per-call transpose) and
    casts it to bf16 only once p is large enough for MXU rate / weight
    bandwidth to matter.  No feature-dim padding: blocks use the full p.
    """
    p = loc.shape[0]
    w_dtype = jnp.bfloat16 if p >= _BF16_P_THRESHOLD else jnp.float32
    loc_row = loc.reshape(1, p).astype(jnp.float32)
    wt = weight.T.astype(w_dtype)                              # (p, p) = W^T
    return loc_row, wt


@jax.jit
def generator_forward(x, loc_row, wt):
    """x: (B, p) f32; loc_row: (1, p) f32; wt: (p, p) pre-transposed W^T."""
    B, p = x.shape
    x = x.astype(jnp.float32)

    # Batch tile: one grid step for small B (amortize per-step overhead);
    # 256-row tiles once B is big enough for pipelining / megacore to pay off.
    tb = B if B <= 512 else 256
    grid = (pl.cdiv(B, tb),)

    w_bytes = wt.size * wt.dtype.itemsize
    io_tile_bytes = 2 * 2 * (tb * p * 4)            # x + out, double-buffered
    est_vmem = 2 * w_bytes + 2 * (p * 4) + io_tile_bytes

    compiler_kwargs = dict(
        # Independent batch tiles: lets v7x shard the grid across its two
        # TensorCores once the grid has enough substantial steps; harmless at
        # grid=(1,).
        dimension_semantics=("parallel",),
    )
    if est_vmem > _DEFAULT_SCOPED_VMEM:
        # Large-p scaling path only: raise the scoped VMEM limit explicitly.
        # TODO(synk): single-buffer the resident loc/W^T blocks
        # (pipeline_mode=pl.Buffered(1)) once p approaches the v7x 64 MiB cap.
        compiler_kwargs["vmem_limit_bytes"] = min(
            int(est_vmem * 1.25) + (4 << 20), 100 << 20)

    cost = pl.CostEstimate(
        flops=2 * B * p * p,
        transcendentals=0,
        bytes_accessed=2 * (B * p * 4) + p * 4 + w_bytes,
    )

    return pl.pallas_call(
        generator_kernel,
        out_shape=jax.ShapeDtypeStruct((B, p), jnp.float32),
        grid_spec=pltpu.PrefetchScalarGridSpec(
            num_scalar_prefetch=0,
            grid=grid,
            in_specs=[
                pl.BlockSpec((tb, p), lambda i: (i, 0)),   # x tile (pipelined)
                pl.BlockSpec((1, p), lambda i: (0, 0)),    # loc  (resident)
                pl.BlockSpec((p, p), lambda i: (0, 0)),    # W^T  (resident)
            ],
            out_specs=pl.BlockSpec((tb, p), lambda i: (i, 0)),
        ),
        compiler_params=pltpu.CompilerParams(**compiler_kwargs),
        cost_estimate=cost,
    )(x, loc_row, wt)


if __name__ == "__main__":
    key = jax.random.PRNGKey(0)
    B, P = 64, 32                      # small shapes consistent with the module
    k_x, k_w, k_loc = jax.random.split(key, 3)

    # PyTorch init: loc = zeros(p); use small nonzero values so the add path
    # is exercised. nn.Linear default weight init: U(-1/sqrt(p), 1/sqrt(p)).
    loc = 0.01 * jax.random.normal(k_loc, (P,), dtype=jnp.float32)
    bound = 1.0 / math.sqrt(P)
    weight = jax.random.uniform(
        k_w, (P, P), dtype=jnp.float32, minval=-bound, maxval=bound)
    x = jax.random.normal(k_x, (B, P), dtype=jnp.float32)

    # One-time parameter prep (transpose hoist), then the forward call.
    loc_row, wt = prepare_generator_params(loc, weight)
    out = generator_forward(x, loc_row, wt)
    out = jax.block_until_ready(out)

    # Pure-JAX f32 reference. At p=32 the kernel runs the matmul in f32, so the
    # tolerance only needs to cover MXU f32-pass rounding vs the XLA dot.
    ref = (x + loc[None, :]) @ weight.T
    assert out.shape == (B, P)
    assert jnp.allclose(out, ref, atol=1e-2, rtol=1e-2), "mismatch vs reference"

    print("KERNEL_OK")
</pallas_src>

<mosaic_0001>
module attributes {stable_mosaic.version = 11 : i64} {
  func.func @generator_kernel(%arg0: i32, %arg1: memref<64x32xf32, #tpu.memory_space<vmem>>, %arg2: memref<1x32xf32, #tpu.memory_space<vmem>>, %arg3: memref<32x32xf32, #tpu.memory_space<vmem>>, %arg4: memref<64x32xf32, #tpu.memory_space<vmem>>) attributes {dimension_semantics = [#tpu.dimension_semantics<parallel>], iteration_bounds = array<i64: 1>, scalar_prefetch = 0 : i64, scratch_operands = 0 : i64, tpu.core_type = #tpu.core_type<tc>, window_params = [{transform_indices = @transform_0, window_bounds = array<i64: 64, 32>}, {pipeline_mode = #tpu.pipeline_mode<synchronous>, transform_indices = @transform_1, window_bounds = array<i64: 1, 32>}, {pipeline_mode = #tpu.pipeline_mode<synchronous>, transform_indices = @transform_2, window_bounds = array<i64: 32, 32>}, {transform_indices = @transform_3, window_bounds = array<i64: 64, 32>}]} {
    %c0 = arith.constant 0 : index
    %c0_0 = arith.constant 0 : index
    %0 = vector.load %arg1[%c0, %c0_0] : memref<64x32xf32, #tpu.memory_space<vmem>>, vector<64x32xf32>
    %c0_1 = arith.constant 0 : index
    %c0_2 = arith.constant 0 : index
    %1 = vector.load %arg2[%c0_1, %c0_2] : memref<1x32xf32, #tpu.memory_space<vmem>>, vector<1x32xf32>
    %2 = vector.broadcast %1 : vector<1x32xf32> to vector<64x32xf32>
    %3 = arith.addf %0, %2 : vector<64x32xf32>
    %c0_3 = arith.constant 0 : index
    %c0_4 = arith.constant 0 : index
    %4 = vector.load %arg3[%c0_3, %c0_4] : memref<32x32xf32, #tpu.memory_space<vmem>>, vector<32x32xf32>
    %cst = arith.constant dense<0.000000e+00> : vector<64x32xf32>
    %5 = tpu.matmul %3, %4, %cst {dimension_numbers = #tpu.dot_dimension_numbers<[1], [0], [0], [1], [0, 0, 1, 1], [], []>} : vector<64x32xf32>, vector<32x32xf32>, vector<64x32xf32> -> vector<64x32xf32>
    %c0_5 = arith.constant 0 : index
    %c0_6 = arith.constant 0 : index
    %6 = vector.load %arg4[%c0_5, %c0_6] : memref<64x32xf32, #tpu.memory_space<vmem>>, vector<64x32xf32>
    tpu.vector_store %arg4[%c0_5, %c0_6], %5 {strides = array<i32>} : memref<64x32xf32, #tpu.memory_space<vmem>>, vector<64x32xf32>,
    return
  }
  func.func @transform_0(%arg0: i32) -> (i32, i32) {
    %c0_i32 = arith.constant 0 : i32
    %c0_i32_0 = arith.constant 0 : i32
    return %arg0, %c0_i32 : i32, i32
  }
  func.func @transform_1(%arg0: i32) -> (i32, i32) {
    %c0_i32 = arith.constant 0 : i32
    %c0_i32_0 = arith.constant 0 : i32
    %c0_i32_1 = arith.constant 0 : i32
    return %c0_i32, %c0_i32_0 : i32, i32
  }
  func.func @transform_2(%arg0: i32) -> (i32, i32) {
    %c0_i32 = arith.constant 0 : i32
    %c0_i32_0 = arith.constant 0 : i32
    %c0_i32_1 = arith.constant 0 : i32
    return %c0_i32, %c0_i32_0 : i32, i32
  }
  func.func @transform_3(%arg0: i32) -> (i32, i32) {
    %c0_i32 = arith.constant 0 : i32
    %c0_i32_0 = arith.constant 0 : i32
    return %arg0, %c0_i32 : i32, i32
  }
}

</mosaic_0001>

<bundles_post_ra>
// kernel: generator_forward.1
= control target key start
LH: loop header
LB: loop body
LE: loop exit
PB: predicated region body
PF: predicated region fallthrough
CT: control target
= control target key end

     0   :  { %vm41_vm0 = vcmask 261120   ;;  %s335_s2 = inlined_call_operand.vmem [shape: f32[32,32], index: 2, kind: input, shape index: {}]   ;;  %s336_s0 = inlined_call_operand.vmem [shape: f32[64,32], index: 0, kind: input, shape index: {}]   ;;  %s337_s1 = inlined_call_operand.vmem [shape: f32[1,32], index: 1, kind: input, shape index: {}]   ;;  %s338_s3 = inlined_call_operand.vmem [shape: f32[64,32], index: 3, kind: output, shape index: {}]  }
   0x1   :  { %v37_v0 = vld [vmem:[%s335_s2] sm:$0xff]  ;;  %v38_v1 = vld [vmem:[%s335_s2 + $0x8] sm:$0xff]  ;;  %v39_v2 = vld [vmem:[%s335_s2 + $0x10] sm:$0xff] }
   0x2   :  { %v224_v3 = vpack.c.bf16 %v38_v1, %v37_v0  ;;  %v40_v4 = vld [vmem:[%s335_s2 + $0x18] sm:$0xff]  ;;  %v14_v5 = vld [vmem:[%s336_s0] sm:$0xff]  ;;  %v15_v11 = vld [vmem:[%s336_s0 + $0x8] sm:$0xff] }
   0x3   :  { %v183_v6 = vld [vmem:[%s337_s1] ss:$0 sm:$0xff]  ;;  %v228_v7 = vpack.c.bf16 %v40_v4, %v39_v2  ;;  %v19_v12 = vld [vmem:[%s336_s0 + $0x28] sm:$0xff]  ;;  %v16_v13 = vld [vmem:[%s336_s0 + $0x10] sm:$0xff] }
   0x4   :  { %v29_v8 = vadd.f32 %v183_v6, %v14_v5  ;;  %v18_v9 = vld [vmem:[%s336_s0 + $0x20] sm:$0xff]  ;;  %225 = vmatprep.subr.bf16.mxu0 %v224_v3  ;;  %232 = vmatprep.subr.bf16.mxu1 %v224_v3  ;;  %v20_v14 = vld [vmem:[%s336_s0 + $0x30] sm:$0xff]  ;;  %v30_v15 = vadd.f32 %v183_v6, %v15_v11  ;;  %v34_v16 = vadd.f32 %v183_v6, %v19_v12  ;;  %v17_v19 = vld [vmem:[%s336_s0 + $0x18] sm:$0xff] }
   0x5   :  { %v33_v10 = vadd.f32 %v183_v6, %v18_v9  ;;  %227 = vmatpush3.bf16.msra.mxu0 %v224_v3  ;;  %234 = vmatpush3.bf16.msra.mxu1 %v224_v3  ;;  %v31_v17 = vadd.f32 %v183_v6, %v16_v13  ;;  %v35_v18 = vadd.f32 %v183_v6, %v20_v14  ;;  %v21_v20 = vld [vmem:[%s336_s0 + $0x38] sm:$0xff] }
   0x6   :  { %229 = vmatprep.subr.bf16.mxu0 %v228_v7  ;;  %233 = vmatprep.subr.bf16.mxu1 %v228_v7  ;;  %v32_v21 = vadd.f32 %v183_v6, %v17_v19  ;;  %v36_v22 = vadd.f32 %v183_v6, %v21_v20 }
   0x7   :  { %212 = vmatprep.mubr.msk.f32.mxu0 %vm41_vm0, %v29_v8  ;;  %218 = vmatprep.mubr.msk.f32.mxu1 %vm41_vm0, %v33_v10 }
   0x9   :  { %231 = vmatpush3.bf16.msra.mxu0 %v228_v7  ;;  %235 = vmatpush3.bf16.msra.mxu1 %v228_v7 }
   0xc   :  { %213 = vmatmul.mubr.msk.f32.vlgmr.msra.gmra.mrb[0].mxu0 %vm41_vm0, %v30_v15  ;;  %219 = vmatmul.mubr.msk.f32.vlgmr.msra.gmra.mrb[0].mxu1 %vm41_vm0, %v34_v16 }
   0xd   :  { %215 = vmatprep.mubr.msk.f32.mxu0 %vm41_vm0, %v31_v17  ;;  %221 = vmatprep.mubr.msk.f32.mxu1 %vm41_vm0, %v35_v18 }
  0x10   :  { %216 = vmatmul.mubr.msk.f32.gmra.mrb[2].mxu0 %vm41_vm0, %v32_v21  ;;  %222 = vmatmul.mubr.msk.f32.gmra.mrb[2].mxu1 %vm41_vm0, %v36_v22 }
  0xdf   :  { %v214_v23 = vpop.f32.mrb[0].mxu0  ;;  %v220_v24 = vpop.f32.mrb[0].mxu1 }
  0xe0   :  { %172 = vst.msk [vmem:[%s338_s3 + $0x8] sm:$0xff] %vm41_vm0, %v214_v23  ;;  %176 = vst.msk [vmem:[%s338_s3 + $0x28] sm:$0xff] %vm41_vm0, %v220_v24  ;;  %v132_v25 = vpop.f32.mrb[1].mxu0  ;;  %v152_v26 = vpop.f32.mrb[1].mxu1 }
  0xe1   :  { %171 = vst.msk [vmem:[%s338_s3] sm:$0xff] %vm41_vm0, %v132_v25  ;;  %175 = vst.msk [vmem:[%s338_s3 + $0x20] sm:$0xff] %vm41_vm0, %v152_v26 }
  0xe3   :  { %v217_v27 = vpop.f32.mrb[2].mxu0  ;;  %v223_v28 = vpop.f32.mrb[2].mxu1 }
  0xe4   :  { %174 = vst.msk [vmem:[%s338_s3 + $0x18] sm:$0xff] %vm41_vm0, %v217_v27  ;;  %178 = vst.msk [vmem:[%s338_s3 + $0x38] sm:$0xff] %vm41_vm0, %v223_v28  ;;  %v142_v29 = vpop.f32.mrb[3].mxu0  ;;  %v162_v30 = vpop.f32.mrb[3].mxu1 }
  0xe5   :  { %173 = vst.msk [vmem:[%s338_s3 + $0x10] sm:$0xff] %vm41_vm0, %v142_v29  ;;  %177 = vst.msk [vmem:[%s338_s3 + $0x30] sm:$0xff] %vm41_vm0, %v162_v30 }

</bundles_post_ra>
